<compile_context>
chip_gen: v7x
topology: tpu7x:2x2x1
jax: 0.10.0
libtpu: 0.0.40
codegen_flags: <defaults>
</compile_context>

<pallas_src>
import functools
import math
from dataclasses import dataclass

import jax
import jax.numpy as jnp
import numpy as np
from jax.experimental import pallas as pl
from jax.experimental.pallas import tpu as pltpu

VMEM_LIMIT = 32 * 1024 * 1024  # safe on v5e/v6e/v7x; toy usage is far below this


def _cparams(*sems):
    return pltpu.CompilerParams(dimension_semantics=tuple(sems),
                                vmem_limit_bytes=VMEM_LIMIT)


def _pick_tile(dim, preferred, align):
    """Largest tile <= preferred that divides dim and is a multiple of align,
    falling back to the full dim (always legal for BlockSpec)."""
    if dim <= preferred:
        return dim
    t = (preferred // align) * align
    while t >= align:
        if dim % t == 0:
            return t
        t -= align
    return dim


# ----------------------------- Pallas kernels ------------------------------

def _matmul_kernel(x_ref, w_ref, o_ref):
    o_ref[...] = jnp.dot(x_ref[...], w_ref[...],
                         preferred_element_type=jnp.float32).astype(o_ref.dtype)


def matmul(x, w, *, tm_pref=256):
    """y = x @ w, M-tiled (used for the conv3d-as-matmul patch embed)."""
    M, K = x.shape
    N = w.shape[1]
    tm = _pick_tile(M, tm_pref, 8)
    return pl.pallas_call(
        _matmul_kernel,
        out_shape=jax.ShapeDtypeStruct((M, N), x.dtype),
        grid=(M // tm,),
        in_specs=[pl.BlockSpec((tm, K), lambda i: (i, 0)),
                  pl.BlockSpec((K, N), lambda i: (0, 0))],
        out_specs=pl.BlockSpec((tm, N), lambda i: (i, 0)),
        compiler_params=_cparams("parallel"),
    )(x, w)


def _layernorm_kernel(x_ref, g_ref, b_ref, o_ref, *, eps):
    x = x_ref[...].astype(jnp.float32)
    mean = jnp.mean(x, axis=-1, keepdims=True)
    var = jnp.mean(jnp.square(x - mean), axis=-1, keepdims=True)
    y = (x - mean) * jax.lax.rsqrt(var + eps)
    o_ref[...] = (y * g_ref[...].astype(jnp.float32)
                  + b_ref[...].astype(jnp.float32)).astype(o_ref.dtype)


def layernorm(x, g, b, *, eps=1e-6, tm_pref=512):
    M, D = x.shape
    tm = _pick_tile(M, tm_pref, 8)
    return pl.pallas_call(
        functools.partial(_layernorm_kernel, eps=eps),
        out_shape=jax.ShapeDtypeStruct((M, D), x.dtype),
        grid=(M // tm,),
        in_specs=[pl.BlockSpec((tm, D), lambda i: (i, 0)),
                  pl.BlockSpec((1, D), lambda i: (0, 0)),
                  pl.BlockSpec((1, D), lambda i: (0, 0))],
        out_specs=pl.BlockSpec((tm, D), lambda i: (i, 0)),
        compiler_params=_cparams("parallel"),
    )(x, g.reshape(1, D), b.reshape(1, D))


def _ln_qkv_rope_kernel(x_ref, g_ref, b_ref, w_ref, qb_ref, cos_ref, sin_ref,
                        q_ref, k_ref, v_ref, *, num_heads, head_dim, eps):
    # LayerNorm in f32 statistics.
    x = x_ref[...].astype(jnp.float32)
    mean = jnp.mean(x, axis=-1, keepdims=True)
    var = jnp.mean(jnp.square(x - mean), axis=-1, keepdims=True)
    h = (x - mean) * jax.lax.rsqrt(var + eps)
    h = h * g_ref[...].astype(jnp.float32) + b_ref[...].astype(jnp.float32)

    # Fused QKV projection (native-dtype operands, f32 accumulation).
    y = jnp.dot(h.astype(w_ref.dtype), w_ref[...],
                preferred_element_type=jnp.float32)
    y = y + qb_ref[...].astype(jnp.float32)

    E = num_heads * head_dim
    half = head_dim // 2
    cos = cos_ref[...].astype(jnp.float32)   # (tm, head_dim)
    sin = sin_ref[...].astype(jnp.float32)

    def rope(t):  # per-head rotate_half * sin + x * cos on the lane-dense layout
        parts = []
        for hh in range(num_heads):
            th = t[:, hh * head_dim:(hh + 1) * head_dim]
            rot = jnp.concatenate([-th[:, half:], th[:, :half]], axis=-1)
            parts.append(th * cos + rot * sin)
        return jnp.concatenate(parts, axis=-1)

    q_ref[...] = rope(y[:, :E]).astype(q_ref.dtype)
    k_ref[...] = rope(y[:, E:2 * E]).astype(k_ref.dtype)
    v_ref[...] = y[:, 2 * E:].astype(v_ref.dtype)


def ln_qkv_rope(x, g, b, w, qb, cos, sin, num_heads, *, eps=1e-6, tm_pref=256):
    M, E = x.shape
    D = E // num_heads
    tm = _pick_tile(M, tm_pref, 8)
    out = jax.ShapeDtypeStruct((M, E), x.dtype)
    return pl.pallas_call(
        functools.partial(_ln_qkv_rope_kernel, num_heads=num_heads,
                          head_dim=D, eps=eps),
        out_shape=(out, out, out),
        grid=(M // tm,),
        in_specs=[pl.BlockSpec((tm, E), lambda i: (i, 0)),
                  pl.BlockSpec((1, E), lambda i: (0, 0)),
                  pl.BlockSpec((1, E), lambda i: (0, 0)),
                  pl.BlockSpec((E, 3 * E), lambda i: (0, 0)),
                  pl.BlockSpec((1, 3 * E), lambda i: (0, 0)),
                  pl.BlockSpec((tm, D), lambda i: (i, 0)),
                  pl.BlockSpec((tm, D), lambda i: (i, 0))],
        out_specs=(pl.BlockSpec((tm, E), lambda i: (i, 0)),
                   pl.BlockSpec((tm, E), lambda i: (i, 0)),
                   pl.BlockSpec((tm, E), lambda i: (i, 0))),
        compiler_params=_cparams("parallel"),
    )(x, g.reshape(1, E), b.reshape(1, E), w, qb.reshape(1, 3 * E), cos, sin)


def _flash_attn_kernel(q_ref, k_ref, v_ref, sq_ref, sk_ref, o_ref,
                       m_scr, l_scr, acc_scr, *, num_heads, head_dim, scale):
    j = pl.program_id(1)

    @pl.when(j == 0)
    def _():
        m_scr[...] = jnp.full_like(m_scr, -1e30)
        l_scr[...] = jnp.zeros_like(l_scr)
        acc_scr[...] = jnp.zeros_like(acc_scr)

    # Block-diagonal (segment) mask built in-kernel from segment ids;
    # no (S, S) bias is materialized or DMA'd.
    mask = sq_ref[...] == sk_ref[...]          # (tq, 1) == (1, tkv) -> (tq, tkv)

    q = q_ref[...]
    k = k_ref[...]
    v = v_ref[...]

    for h in range(num_heads):
        sl = slice(h * head_dim, (h + 1) * head_dim)
        # q @ k^T without an explicit transpose (contract last dims).
        s = jax.lax.dot_general(q[:, sl], k[:, sl],
                                (((1,), (1,)), ((), ())),
                                preferred_element_type=jnp.float32) * scale
        s = jnp.where(mask, s, -1e30)          # f32 scores, finite mask value
        m_prev = m_scr[:, h:h + 1]
        m_new = jnp.maximum(m_prev, jnp.max(s, axis=-1, keepdims=True))
        alpha = jnp.exp(m_prev - m_new)
        p = jnp.where(mask, jnp.exp(s - m_new), 0.0)
        l_scr[:, h:h + 1] = alpha * l_scr[:, h:h + 1] + jnp.sum(p, axis=-1,
                                                                keepdims=True)
        acc_scr[:, sl] = alpha * acc_scr[:, sl] + jnp.dot(
            p.astype(v.dtype), v[:, sl], preferred_element_type=jnp.float32)
        m_scr[:, h:h + 1] = m_new

    @pl.when(j == pl.num_programs(1) - 1)
    def _():
        parts = []
        for h in range(num_heads):
            sl = slice(h * head_dim, (h + 1) * head_dim)
            inv = pl.reciprocal(l_scr[:, h:h + 1], approx=True)
            parts.append(acc_scr[:, sl] * inv)
        o_ref[...] = jnp.concatenate(parts, axis=-1).astype(o_ref.dtype)


def flash_attention(q, k, v, seg_q, seg_kt, num_heads, *,
                    tq_pref=256, tkv_pref=512):
    """q, k, v: (S, H*D) lane-dense; seg_q: (S, 1) int32; seg_kt: (1, S) int32."""
    S, E = q.shape
    D = E // num_heads
    scale = 1.0 / math.sqrt(D)
    tq = _pick_tile(S, tq_pref, 8)
    tkv = _pick_tile(S, tkv_pref, 128)
    return pl.pallas_call(
        functools.partial(_flash_attn_kernel, num_heads=num_heads,
                          head_dim=D, scale=scale),
        out_shape=jax.ShapeDtypeStruct((S, E), q.dtype),
        grid=(S // tq, S // tkv),
        in_specs=[pl.BlockSpec((tq, E), lambda i, j: (i, 0)),
                  pl.BlockSpec((tkv, E), lambda i, j: (j, 0)),
                  pl.BlockSpec((tkv, E), lambda i, j: (j, 0)),
                  pl.BlockSpec((tq, 1), lambda i, j: (i, 0)),
                  pl.BlockSpec((1, tkv), lambda i, j: (0, j))],
        out_specs=pl.BlockSpec((tq, E), lambda i, j: (i, 0)),
        scratch_shapes=[pltpu.VMEM((tq, num_heads), jnp.float32),
                        pltpu.VMEM((tq, num_heads), jnp.float32),
                        pltpu.VMEM((tq, E), jnp.float32)],
        compiler_params=_cparams("parallel", "arbitrary"),
    )(q, k, v, seg_q, seg_kt)


def _proj_residual_kernel(a_ref, w_ref, b_ref, r_ref, o_ref):
    acc = jnp.dot(a_ref[...], w_ref[...], preferred_element_type=jnp.float32)
    acc = acc + b_ref[...].astype(jnp.float32) + r_ref[...].astype(jnp.float32)
    o_ref[...] = acc.astype(o_ref.dtype)


def proj_residual(a, w, b, res, *, tm_pref=256):
    M, K = a.shape
    N = w.shape[1]
    tm = _pick_tile(M, tm_pref, 8)
    return pl.pallas_call(
        _proj_residual_kernel,
        out_shape=jax.ShapeDtypeStruct((M, N), a.dtype),
        grid=(M // tm,),
        in_specs=[pl.BlockSpec((tm, K), lambda i: (i, 0)),
                  pl.BlockSpec((K, N), lambda i: (0, 0)),
                  pl.BlockSpec((1, N), lambda i: (0, 0)),
                  pl.BlockSpec((tm, N), lambda i: (i, 0))],
        out_specs=pl.BlockSpec((tm, N), lambda i: (i, 0)),
        compiler_params=_cparams("parallel"),
    )(a, w, b.reshape(1, N), res)


def _ln_mlp_residual_kernel(x_ref, g_ref, b_ref, w1_ref, b1_ref, w2_ref, b2_ref,
                            o_ref, ln_scr, acc_scr, *, eps):
    hidx = pl.program_id(1)

    @pl.when(hidx == 0)
    def _():
        x = x_ref[...].astype(jnp.float32)
        mean = jnp.mean(x, axis=-1, keepdims=True)
        var = jnp.mean(jnp.square(x - mean), axis=-1, keepdims=True)
        ln_scr[...] = ((x - mean) * jax.lax.rsqrt(var + eps)
                       * g_ref[...].astype(jnp.float32)
                       + b_ref[...].astype(jnp.float32))
        acc_scr[...] = jnp.zeros_like(acc_scr)

    h = ln_scr[...].astype(w1_ref.dtype)
    t = jnp.dot(h, w1_ref[...], preferred_element_type=jnp.float32)
    t = t + b1_ref[...].astype(jnp.float32)
    t = t * jax.nn.sigmoid(t)                                   # SiLU
    acc_scr[...] += jnp.dot(t.astype(w2_ref.dtype), w2_ref[...],
                            preferred_element_type=jnp.float32)

    @pl.when(hidx == pl.num_programs(1) - 1)
    def _():
        out = (acc_scr[...] + b2_ref[...].astype(jnp.float32)
               + x_ref[...].astype(jnp.float32))
        o_ref[...] = out.astype(o_ref.dtype)


def ln_mlp_residual(x, g, b, w1, b1, w2, b2, *, eps=1e-6,
                    tm_pref=256, th_pref=512):
    M, E = x.shape
    Hm = w1.shape[1]
    tm = _pick_tile(M, tm_pref, 8)
    th = _pick_tile(Hm, th_pref, 128)
    return pl.pallas_call(
        functools.partial(_ln_mlp_residual_kernel, eps=eps),
        out_shape=jax.ShapeDtypeStruct((M, E), x.dtype),
        grid=(M // tm, Hm // th),
        in_specs=[pl.BlockSpec((tm, E), lambda i, h: (i, 0)),
                  pl.BlockSpec((1, E), lambda i, h: (0, 0)),
                  pl.BlockSpec((1, E), lambda i, h: (0, 0)),
                  pl.BlockSpec((E, th), lambda i, h: (0, h)),
                  pl.BlockSpec((1, th), lambda i, h: (0, h)),
                  pl.BlockSpec((th, E), lambda i, h: (h, 0)),
                  pl.BlockSpec((1, E), lambda i, h: (0, 0))],
        out_specs=pl.BlockSpec((tm, E), lambda i, h: (i, 0)),
        scratch_shapes=[pltpu.VMEM((tm, E), jnp.float32),
                        pltpu.VMEM((tm, E), jnp.float32)],
        compiler_params=_cparams("parallel", "arbitrary"),
    )(x, g.reshape(1, E), b.reshape(1, E), w1, b1.reshape(1, Hm), w2,
      b2.reshape(1, E))


def _merger_head_kernel(x_ref, w1_ref, b1_ref, w2_ref, b2_ref, w3_ref, o_ref):
    h = jnp.dot(x_ref[...], w1_ref[...], preferred_element_type=jnp.float32)
    h = jax.nn.gelu(h + b1_ref[...].astype(jnp.float32), approximate=False)
    h = jnp.dot(h.astype(w2_ref.dtype), w2_ref[...],
                preferred_element_type=jnp.float32)
    h = h + b2_ref[...].astype(jnp.float32)
    o_ref[...] = jnp.dot(h.astype(w3_ref.dtype), w3_ref[...],
                         preferred_element_type=jnp.float32).astype(o_ref.dtype)


def merger_head(x, w1, b1, w2, b2, w3, *, tm_pref=128):
    # Note: at production Qwen2-VL sizes m1 (5120x5120) would need N/K tiling;
    # for this config the weights fit comfortably in one resident block.
    M, K = x.shape
    H1 = w1.shape[1]
    H2 = w2.shape[1]
    V = w3.shape[1]
    tm = _pick_tile(M, tm_pref, 8)
    return pl.pallas_call(
        _merger_head_kernel,
        out_shape=jax.ShapeDtypeStruct((M, V), x.dtype),
        grid=(M // tm,),
        in_specs=[pl.BlockSpec((tm, K), lambda i: (i, 0)),
                  pl.BlockSpec((K, H1), lambda i: (0, 0)),
                  pl.BlockSpec((1, H1), lambda i: (0, 0)),
                  pl.BlockSpec((H1, H2), lambda i: (0, 0)),
                  pl.BlockSpec((1, H2), lambda i: (0, 0)),
                  pl.BlockSpec((H2, V), lambda i: (0, 0))],
        out_specs=pl.BlockSpec((tm, V), lambda i: (i, 0)),
        compiler_params=_cparams("parallel"),
    )(x, w1, b1.reshape(1, H1), w2, b2.reshape(1, H2), w3)


# --------------------------- host-side glue (numpy) -------------------------

def rot_pos_emb_host(grid_thw, spatial_merge_size, rot_dim, theta=10000.0):
    """Reproduces Qwen2VLBaseline.rot_pos_emb (pure index/table math)."""
    sms = spatial_merge_size
    pos_ids = []
    for t, h, w in grid_thw:
        hpos = np.broadcast_to(np.arange(h)[:, None], (h, w)).copy()
        hpos = hpos.reshape(h // sms, sms, w // sms, sms).transpose(0, 2, 1, 3).reshape(-1)
        wpos = np.broadcast_to(np.arange(w)[None, :], (h, w)).copy()
        wpos = wpos.reshape(h // sms, sms, w // sms, sms).transpose(0, 2, 1, 3).reshape(-1)
        pos_ids.append(np.tile(np.stack([hpos, wpos], axis=-1), (int(t), 1)))
    pos_ids = np.concatenate(pos_ids, axis=0)
    max_grid = int(grid_thw[:, 1:].max())
    inv_freq = 1.0 / theta ** (np.arange(0, rot_dim, 2, dtype=np.float32) / rot_dim)
    freqs = np.outer(np.arange(max_grid, dtype=np.float32), inv_freq)
    emb = freqs[pos_ids]                                    # (seq, 2, rot_dim//2)
    return emb.reshape(emb.shape[0], -1).astype(np.float32)  # (seq, rot_dim)


def build_seg_ids(grid_thw):
    """Segment id per token (from cu_seqlens), as (S,1) and (1,S) int32."""
    seqlens = np.repeat(grid_thw[:, 1] * grid_thw[:, 2], grid_thw[:, 0])
    seg = np.repeat(np.arange(len(seqlens)), seqlens).astype(np.int32)
    return jnp.asarray(seg[:, None]), jnp.asarray(seg[None, :])


# --------------------------------- model ------------------------------------

@dataclass(frozen=True)
class Config:
    patch_size: int = 4
    temporal_patch_size: int = 2
    in_channels: int = 3
    embed_dim: int = 16
    num_heads: int = 2
    mlp_ratio: float = 2.0
    depth: int = 2
    hidden_size: int = 32
    vocab_size: int = 128
    spatial_merge_size: int = 8   # matches PatchMerger's hard-coded default of 8
    hidden_act: str = "silu"
    _attn_implementation: str = "sdpa"


def init_params(key, cfg: Config):
    mlp_hidden = int(cfg.embed_dim * cfg.mlp_ratio)
    merger_hidden = cfg.embed_dim * 8 ** 2      # PatchMerger default sms=8
    patch_in = cfg.in_channels * cfg.temporal_patch_size * cfg.patch_size ** 2

    keys = iter(jax.random.split(key, 8 + 8 * cfg.depth))

    def w(shape, scale=0.02):
        return scale * jax.random.normal(next(keys), shape, jnp.float32)

    params = {
        "patch_proj": w((patch_in, cfg.embed_dim)),
        "blocks": [],
        "lnq_g": jnp.ones((cfg.embed_dim,), jnp.float32),
        "lnq_b": jnp.zeros((cfg.embed_dim,), jnp.float32),
        "m1_w": w((merger_hidden, merger_hidden)),
        "m1_b": jnp.zeros((merger_hidden,), jnp.float32),
        "m2_w": w((merger_hidden, cfg.hidden_size)),
        "m2_b": jnp.zeros((cfg.hidden_size,), jnp.float32),
        "lm_w": w((cfg.hidden_size, cfg.vocab_size)),
    }
    for _ in range(cfg.depth):
        params["blocks"].append({
            "ln1_g": jnp.ones((cfg.embed_dim,), jnp.float32),
            "ln1_b": jnp.zeros((cfg.embed_dim,), jnp.float32),
            "ln2_g": jnp.ones((cfg.embed_dim,), jnp.float32),
            "ln2_b": jnp.zeros((cfg.embed_dim,), jnp.float32),
            "qkv_w": w((cfg.embed_dim, 3 * cfg.embed_dim)),
            "qkv_b": w((3 * cfg.embed_dim,)),
            "proj_w": w((cfg.embed_dim, cfg.embed_dim)),
            "proj_b": w((cfg.embed_dim,)),
            "fc1_w": w((cfg.embed_dim, mlp_hidden)),
            "fc1_b": w((mlp_hidden,)),
            "fc2_w": w((mlp_hidden, cfg.embed_dim)),
            "fc2_b": w((cfg.embed_dim,)),
        })
    return params


def qwen2vl_forward(params, hidden_states, grid_thw_np, cfg: Config):
    E = cfg.embed_dim
    H = cfg.num_heads
    D = E // H
    patch_in = cfg.in_channels * cfg.temporal_patch_size * cfg.patch_size ** 2

    # patch embed: Conv3d(kernel==stride, no bias) == matmul over flat patches
    x = matmul(hidden_states.reshape(-1, patch_in), params["patch_proj"])  # (S, E)

    # host-side index/table math (pure numpy)
    rotary = rot_pos_emb_host(grid_thw_np, cfg.spatial_merge_size, D // 2)  # (S, D//2)
    cos = jnp.asarray(np.tile(np.cos(rotary), (1, 2)))                      # (S, D)
    sin = jnp.asarray(np.tile(np.sin(rotary), (1, 2)))                      # (S, D)
    seg_q, seg_kt = build_seg_ids(grid_thw_np)                              # (S,1),(1,S)

    for blk in params["blocks"]:
        q, k, v = ln_qkv_rope(x, blk["ln1_g"], blk["ln1_b"], blk["qkv_w"],
                              blk["qkv_b"], cos, sin, H)        # each (S, E), lane-dense
        ao = flash_attention(q, k, v, seg_q, seg_kt, H)         # (S, E)
        x = proj_residual(ao, blk["proj_w"], blk["proj_b"], x)  # (S, E)
        x = ln_mlp_residual(x, blk["ln2_g"], blk["ln2_b"], blk["fc1_w"],
                            blk["fc1_b"], blk["fc2_w"], blk["fc2_b"])

    # PatchMerger (uses its hard-coded default spatial_merge_size=8)
    xq = layernorm(x, params["lnq_g"], params["lnq_b"])          # (S, E)
    xq = xq.reshape(-1, cfg.embed_dim * 8 ** 2)                  # free row-major reshape
    return merger_head(xq, params["m1_w"], params["m1_b"],
                       params["m2_w"], params["m2_b"], params["lm_w"])


# --------------------------------- driver ------------------------------------

if __name__ == "__main__":
    cfg = Config()
    key = jax.random.PRNGKey(0)
    kp, kx = jax.random.split(key)
    params = init_params(kp, cfg)

    # one "image": t=1, h=8, w=8  ->  64 patches of 3*2*4*4 = 96 values each
    grid_thw = np.array([[1, 8, 8]], dtype=np.int64)
    seq = int(np.prod(grid_thw[0]))
    patch_dim = cfg.in_channels * cfg.temporal_patch_size * cfg.patch_size ** 2
    hidden_states = jax.random.normal(kx, (seq, patch_dim), jnp.float32)

    out = qwen2vl_forward(params, hidden_states, grid_thw, cfg)
    out = jax.block_until_ready(out)
    assert out.shape == (seq // 64, cfg.vocab_size)
    print("KERNEL_OK")
</pallas_src>

<mosaic_0001>
module attributes {stable_mosaic.version = 11 : i64} {
  func.func @_matmul_kernel(%arg0: i32, %arg1: memref<64x96xf32, #tpu.memory_space<vmem>>, %arg2: memref<96x16xf32, #tpu.memory_space<vmem>>, %arg3: memref<64x16xf32, #tpu.memory_space<vmem>>) attributes {dimension_semantics = [#tpu.dimension_semantics<parallel>], iteration_bounds = array<i64: 1>, scalar_prefetch = 0 : i64, scratch_operands = 0 : i64, tpu.core_type = #tpu.core_type<tc>, window_params = [{transform_indices = @transform_0, window_bounds = array<i64: 64, 96>}, {pipeline_mode = #tpu.pipeline_mode<synchronous>, transform_indices = @transform_1, window_bounds = array<i64: 96, 16>}, {transform_indices = @transform_2, window_bounds = array<i64: 64, 16>}]} {
    %c0 = arith.constant 0 : index
    %c0_0 = arith.constant 0 : index
    %0 = vector.load %arg1[%c0, %c0_0] : memref<64x96xf32, #tpu.memory_space<vmem>>, vector<64x96xf32>
    %c0_1 = arith.constant 0 : index
    %c0_2 = arith.constant 0 : index
    %1 = vector.load %arg2[%c0_1, %c0_2] : memref<96x16xf32, #tpu.memory_space<vmem>>, vector<96x16xf32>
    %cst = arith.constant dense<0.000000e+00> : vector<64x16xf32>
    %2 = tpu.matmul %0, %1, %cst {dimension_numbers = #tpu.dot_dimension_numbers<[1], [0], [0], [1], [0, 0, 1, 1], [], []>} : vector<64x96xf32>, vector<96x16xf32>, vector<64x16xf32> -> vector<64x16xf32>
    %c0_3 = arith.constant 0 : index
    %c0_4 = arith.constant 0 : index
    %3 = vector.load %arg3[%c0_3, %c0_4] : memref<64x16xf32, #tpu.memory_space<vmem>>, vector<64x16xf32>
    tpu.vector_store %arg3[%c0_3, %c0_4], %2 {strides = array<i32>} : memref<64x16xf32, #tpu.memory_space<vmem>>, vector<64x16xf32>,
    return
  }
  func.func @transform_0(%arg0: i32) -> (i32, i32) {
    %c0_i32 = arith.constant 0 : i32
    %c0_i32_0 = arith.constant 0 : i32
    return %arg0, %c0_i32 : i32, i32
  }
  func.func @transform_1(%arg0: i32) -> (i32, i32) {
    %c0_i32 = arith.constant 0 : i32
    %c0_i32_0 = arith.constant 0 : i32
    %c0_i32_1 = arith.constant 0 : i32
    return %c0_i32, %c0_i32_0 : i32, i32
  }
  func.func @transform_2(%arg0: i32) -> (i32, i32) {
    %c0_i32 = arith.constant 0 : i32
    %c0_i32_0 = arith.constant 0 : i32
    return %arg0, %c0_i32 : i32, i32
  }
}

</mosaic_0001>

<bundles_post_ra>
// kernel: tpu_custom_call.1
= control target key start
LH: loop header
LB: loop body
LE: loop exit
PB: predicated region body
PF: predicated region fallthrough
CT: control target
= control target key end

     0   :  { %vm31_vm0 = vcmask 785408   ;;  %vm161_vm1 = vcmask 130048   ;;  %s389_s1 = inlined_call_operand.vmem [shape: f32[96,16], index: 1, kind: input, shape index: {}]   ;;  %s390_s0 = inlined_call_operand.vmem [shape: f32[64,96], index: 0, kind: input, shape index: {}]   ;;  %s391_s2 = inlined_call_operand.vmem [shape: f32[64,16], index: 2, kind: output, shape index: {}]  }
   0x1   :  { %v19_v0 = vld [vmem:[%s389_s1] sm:$0xff]  ;;  %v20_v1 = vld [vmem:[%s389_s1 + $0x8] sm:$0xff]  ;;  %v21_v2 = vld [vmem:[%s389_s1 + $0x10] sm:$0xff] }
   0x2   :  { %v238_v3 = vpack.c.bf16 %v20_v1, %v19_v0  ;;  %v22_v4 = vld [vmem:[%s389_s1 + $0x18] sm:$0xff]  ;;  %v23_v6 = vld [vmem:[%s389_s1 + $0x20] sm:$0xff]  ;;  %v24_v7 = vld [vmem:[%s389_s1 + $0x28] sm:$0xff] }
   0x3   :  { %v242_v5 = vpack.c.bf16 %v22_v4, %v21_v2  ;;  %v11_v8 = vld [vmem:[%s390_s0] sm:$0xff]  ;;  %v246_v10 = vpack.c.bf16 %v24_v7, %v23_v6  ;;  %v25_v11 = vld [vmem:[%s389_s1 + $0x30] sm:$0xff]  ;;  %v26_v12 = vld [vmem:[%s389_s1 + $0x38] sm:$0xff] }
   0x4   :  { %239 = vmatprep.subr.bf16.mxu0 %v238_v3  ;;  %262 = vmatprep.subr.bf16.mxu1 %v238_v3  ;;  %v15_v9 = vld [vmem:[%s390_s0 + $0x20] sm:$0xff]  ;;  %v250_v13 = vpack.c.bf16 %v26_v12, %v25_v11  ;;  %v28_v15 = vld [vmem:[%s389_s1 + $0x48] sm:$0xff]  ;;  %v29_v17 = vld [vmem:[%s389_s1 + $0x50] sm:$0xff] }
   0x5   :  { %241 = vmatpush3.bf16.msra.mxu0 %v238_v3  ;;  %268 = vmatpush3.bf16.msra.mxu1 %v238_v3  ;;  %v27_v14 = vld [vmem:[%s389_s1 + $0x40] sm:$0xff]  ;;  %v30_v18 = vld [vmem:[%s389_s1 + $0x58] sm:$0xff]  ;;  %v12_v20 = vld [vmem:[%s390_s0 + $0x8] sm:$0xff] }
   0x6   :  { %243 = vmatprep.subr.bf16.mxu0 %v242_v5  ;;  %263 = vmatprep.subr.bf16.mxu1 %v242_v5  ;;  %v254_v16 = vpack.c.bf16 %v28_v15, %v27_v14  ;;  %v258_v19 = vpack.c.bf16 %v30_v18, %v29_v17  ;;  %v16_v21 = vld [vmem:[%s390_s0 + $0x28] sm:$0xff]  ;;  %v13_v22 = vld [vmem:[%s390_s0 + $0x10] sm:$0xff]  ;;  %v14_v24 = vld [vmem:[%s390_s0 + $0x18] sm:$0xff] }
   0x7   :  { %226 = vmatprep.mubr.msk.f32.mxu0 %vm31_vm0, %v11_v8  ;;  %232 = vmatprep.mubr.msk.f32.mxu1 %vm31_vm0, %v15_v9  ;;  %v17_v23 = vld [vmem:[%s390_s0 + $0x30] sm:$0xff]  ;;  %v18_v25 = vld [vmem:[%s390_s0 + $0x38] sm:$0xff] }
   0x9   :  { %245 = vmatpush3.bf16.msra.mxu0 %v242_v5  ;;  %269 = vmatpush3.bf16.msra.mxu1 %v242_v5 }
   0xa   :  { %247 = vmatprep.subr.bf16.mxu0 %v246_v10  ;;  %264 = vmatprep.subr.bf16.mxu1 %v246_v10 }
   0xd   :  { %249 = vmatpush3.bf16.msra.mxu0 %v246_v10  ;;  %270 = vmatpush3.bf16.msra.mxu1 %v246_v10 }
   0xe   :  { %251 = vmatprep.subr.bf16.mxu0 %v250_v13  ;;  %265 = vmatprep.subr.bf16.mxu1 %v250_v13 }
  0x11   :  { %253 = vmatpush3.bf16.msra.mxu0 %v250_v13  ;;  %271 = vmatpush3.bf16.msra.mxu1 %v250_v13 }
  0x12   :  { %255 = vmatprep.subr.bf16.mxu0 %v254_v16  ;;  %266 = vmatprep.subr.bf16.mxu1 %v254_v16 }
  0x15   :  { %257 = vmatpush3.bf16.msra.mxu0 %v254_v16  ;;  %272 = vmatpush3.bf16.msra.mxu1 %v254_v16 }
  0x16   :  { %259 = vmatprep.subr.bf16.mxu0 %v258_v19  ;;  %267 = vmatprep.subr.bf16.mxu1 %v258_v19 }
  0x19   :  { %261 = vmatpush3.bf16.msra.mxu0 %v258_v19  ;;  %273 = vmatpush3.bf16.msra.mxu1 %v258_v19 }
  0x1c   :  { %227 = vmatmul.mubr.msk.f32.vlgmr.msra.gmra.mrb[0].mxu0 %vm31_vm0, %v12_v20  ;;  %233 = vmatmul.mubr.msk.f32.vlgmr.msra.gmra.mrb[0].mxu1 %vm31_vm0, %v16_v21 }
  0x1d   :  { %229 = vmatprep.mubr.msk.f32.mxu0 %vm31_vm0, %v13_v22  ;;  %235 = vmatprep.mubr.msk.f32.mxu1 %vm31_vm0, %v17_v23 }
  0x20   :  { %230 = vmatmul.mubr.msk.f32.gmra.mrb[2].mxu0 %vm31_vm0, %v14_v24  ;;  %236 = vmatmul.mubr.msk.f32.gmra.mrb[2].mxu1 %vm31_vm0, %v18_v25 }
  0xef   :  { %v228_v26 = vpop.f32.mrb[0].mxu0  ;;  %v234_v27 = vpop.f32.mrb[0].mxu1 }
  0xf0   :  { %163 = vst.msk [vmem:[%s391_s2 + $0x8] sm:$0xff] %vm161_vm1, %v228_v26  ;;  %167 = vst.msk [vmem:[%s391_s2 + $0x28] sm:$0xff] %vm161_vm1, %v234_v27  ;;  %v122_v28 = vpop.f32.mrb[1].mxu0  ;;  %v142_v29 = vpop.f32.mrb[1].mxu1 }
  0xf1   :  { %162 = vst.msk [vmem:[%s391_s2] sm:$0xff] %vm161_vm1, %v122_v28  ;;  %166 = vst.msk [vmem:[%s391_s2 + $0x20] sm:$0xff] %vm161_vm1, %v142_v29 }
  0xf3   :  { %v231_v30 = vpop.f32.mrb[2].mxu0  ;;  %v237_v31 = vpop.f32.mrb[2].mxu1 }
  0xf4   :  { %165 = vst.msk [vmem:[%s391_s2 + $0x18] sm:$0xff] %vm161_vm1, %v231_v30  ;;  %169 = vst.msk [vmem:[%s391_s2 + $0x38] sm:$0xff] %vm161_vm1, %v237_v31  ;;  %v132_v32 = vpop.f32.mrb[3].mxu0  ;;  %v152_v33 = vpop.f32.mrb[3].mxu1 }
  0xf5   :  { %164 = vst.msk [vmem:[%s391_s2 + $0x10] sm:$0xff] %vm161_vm1, %v132_v32  ;;  %168 = vst.msk [vmem:[%s391_s2 + $0x30] sm:$0xff] %vm161_vm1, %v152_v33 }

</bundles_post_ra>
